<compile_context>
chip_gen: v6e
topology: v6e:2x2x1
jax: 0.10.0
libtpu: 0.0.40
codegen_flags: <defaults>
</compile_context>

<pallas_src>
import functools

import jax
import jax.numpy as jnp
from jax.experimental import pallas as pl
from jax.experimental.pallas import tpu as pltpu


def _cross_attn_kernel(x_ref, ctx_ref,
                       wqb_ref, bqb_ref,
                       wk_ref, bk_ref,
                       wv_ref, bv_ref,
                       wo_ref, bo_ref,
                       mk_ref,
                       out_ref, att_ref,
                       *, num_heads, depth, seq_len, batch_block, hw):
    # x_ref   : [1, BB*C, HW]   (one batch block, channels-first, batch-major rows)
    # ctx_ref : [BB, S, E]
    # out_ref : [1, BB*C, HW]
    # att_ref : [BB, nH, S, HW]
    nh, d, s_len, bb = num_heads, depth, seq_len, batch_block
    e_dim = nh * d

    x = x_ref[0]            # [BB*C, HW]
    mask_k = mk_ref[...]    # [nH*S, E]  (constant block-diagonal head mask)

    # Q projection for the whole batch block in ONE MXU matmul.  proj_in is
    # folded into Wq on the host and Wq is block-diagonal over the batch block:
    #   q_big = Wq_big [BB*E, BB*C] @ x [BB*C, HW] + bq_big   -> [BB*E, HW]
    q_big = (jnp.dot(wqb_ref[...], x, preferred_element_type=jnp.float32)
             + bqb_ref[...])

    out_rows = []
    # Tiny static trip count (BB <= B); fully unrolled at trace time.
    for b in range(bb):
        ctx_b = ctx_ref[b]                               # [S, E]
        q_t = q_big[b * e_dim:(b + 1) * e_dim, :]        # [E, HW] (static slice)

        # K projection (softmax scale already folded into Wk / bk on the host).
        k = (jnp.dot(ctx_b, wk_ref[...], preferred_element_type=jnp.float32)
             + bk_ref[...])                              # [S, E]
        # V projection in row layout (no context transpose input needed).
        v = (jnp.dot(ctx_b, wv_ref[...], preferred_element_type=jnp.float32)
             + bv_ref[...])                              # [S, E]

        # All heads' scaled QK^T in one MXU matmul via block-diagonal K:
        #   [nH*S, E] @ [E, HW] -> [nH*S, HW]
        k_bd = jnp.tile(k, (nh, 1)) * mask_k
        s_all = jnp.dot(k_bd, q_t, preferred_element_type=jnp.float32)

        # Softmax over the per-head key axis (sublane axis); lanes stay HW-dense.
        s3 = s_all.reshape(nh, s_len, hw)
        s3 = s3 - jnp.max(s3, axis=1, keepdims=True)
        e3 = jnp.exp(s3)
        denom = jnp.sum(e3, axis=1, keepdims=True)
        p3 = e3 * pl.reciprocal(denom, approx=False)     # [nH, S, HW]
        att_ref[b] = p3                                  # lane-dense store

        # Fold proj_out into V:  w2 = V_bd @ W_out -> [nH*S, C]; only this tiny
        # result is transposed (XLU), giving w2^T : [C, nH*S].
        v_bd = jnp.tile(v, (nh, 1)) * mask_k             # [nH*S, E]
        w2 = jnp.dot(v_bd, wo_ref[...], preferred_element_type=jnp.float32)
        w2_t = w2.T                                      # [C, nH*S]

        # out[b]^T = w2^T @ P -> [C, HW]
        out_rows.append(jnp.dot(w2_t, p3.reshape(nh * s_len, hw),
                                preferred_element_type=jnp.float32))

    out_block = out_rows[0] if bb == 1 else jnp.concatenate(out_rows, axis=0)
    # Single lane+sublane-dense slab store: [BB*C, HW].
    out_ref[0] = out_block + bo_ref[...]


def _default_batch_grid():
    """Number of batch blocks to iterate: 2 on 2-TensorCore chips (v7x), else 1."""
    try:
        kind = jax.devices()[0].device_kind.lower()
    except Exception:
        return 1
    return 2 if ("v7" in kind or "7x" in kind) else 1


def cross_multi_attention(x_nchw, context, params, num_heads, batch_grid=None):
    """Pallas implementation of Cross_MultiAttention.forward (pad_mask=None).

    x_nchw  : [B, C, H, W]  (PyTorch NCHW convention)
    context : [B, S, E]
    returns : (out [B, C, H, W], att_weights [B, num_heads, H*W, S])
    """
    B, C, H, W = x_nchw.shape
    _, S, E = context.shape
    assert E % num_heads == 0
    depth = E // num_heads
    scale = float(E) ** (-0.5)
    HW = H * W

    (w_in, b_in, wq, bq, wk, bk, wv, bv, w_out, b_out) = params

    # Grid sizing: G batch blocks of BB elements each.  Single-TC chips collapse
    # the whole batch into one step; v7x keeps a 2-way "parallel" axis.
    if batch_grid is None:
        batch_grid = _default_batch_grid()
    G = batch_grid if (1 <= batch_grid <= B and B % batch_grid == 0) else 1
    BB = B // G

    # ---- Host-side (tiny, one-time) parameter prep -------------------------
    # proj_in folded into Wq; block-diagonal over the batch block so the whole
    # block's Q projection is one matmul against the [BB*C, HW] x slab.
    wqin_t = (w_in @ wq).T                                   # [E, C]
    bqin_c = (b_in @ wq + bq).reshape(E, 1)                  # [E, 1]
    wq_big = jnp.kron(jnp.eye(BB, dtype=jnp.float32), wqin_t)  # [BB*E, BB*C]
    bq_big = jnp.tile(bqin_c, (BB, 1))                       # [BB*E, 1]

    # Softmax scale folded into the K projection (exact algebra).
    wk_s = wk * scale                                        # [E, E]
    bk_s = (bk * scale).reshape(1, E)                        # [1, E]
    bv_row = bv.reshape(1, E)                                # [1, E]
    bo_big = jnp.tile(b_out.reshape(C, 1), (BB, 1))          # [BB*C, 1]

    # Constant block-diagonal head mask (built once, DMA'd once).
    head_row = jnp.arange(num_heads * S) // S
    head_col = jnp.arange(E) // depth
    mask_k = (head_row[:, None] == head_col[None, :]).astype(jnp.float32)  # [nH*S, E]

    # NCHW -> [G, BB*C, HW] is a pure reshape (batch-major rows, no transpose).
    x_big = x_nchw.reshape(G, BB * C, HW)

    kernel = functools.partial(_cross_attn_kernel, num_heads=num_heads,
                               depth=depth, seq_len=S, batch_block=BB, hw=HW)

    full = lambda shape: pl.BlockSpec(shape, lambda i, _s=shape: (0,) * len(_s))

    out_big, att_native = pl.pallas_call(
        kernel,
        out_shape=(
            jax.ShapeDtypeStruct((G, BB * C, HW), jnp.float32),
            jax.ShapeDtypeStruct((B, num_heads, S, HW), jnp.float32),
        ),
        grid_spec=pltpu.PrefetchScalarGridSpec(
            num_scalar_prefetch=0,
            grid=(G,),
            in_specs=[
                pl.BlockSpec((1, BB * C, HW), lambda i: (i, 0, 0)),   # x slab
                pl.BlockSpec((BB, S, E), lambda i: (i, 0, 0)),        # context
                full((BB * E, BB * C)),   # block-diag (W_in @ Wq)^T
                full((BB * E, 1)),        # tiled (b_in @ Wq + bq)^T
                full((E, E)),             # Wk * scale
                full((1, E)),             # bk * scale
                full((E, E)),             # Wv
                full((1, E)),             # bv
                full((E, C)),             # W_out
                full((BB * C, 1)),        # tiled b_out^T
                full((num_heads * S, E)),  # block-diagonal head mask
            ],
            out_specs=[
                pl.BlockSpec((1, BB * C, HW), lambda i: (i, 0, 0)),
                pl.BlockSpec((BB, num_heads, S, HW), lambda i: (i, 0, 0, 0)),
            ],
        ),
        compiler_params=pltpu.CompilerParams(
            dimension_semantics=("parallel",)),
    )(x_big, context, wq_big, bq_big, wk_s, bk_s, wv, bv_row, w_out, bo_big,
      mask_k)

    out_nchw = out_big.reshape(B, C, H, W)             # pure reshape back to NCHW
    att = jnp.transpose(att_native, (0, 1, 3, 2))      # [B, nH, HW, S] (small)
    return out_nchw, att


def _make_params(key, in_channels, emb_dim):
    """Deterministic synthetic parameters (matmul-ready in x out layouts)."""
    ks = jax.random.split(key, 10)
    scale = 0.05
    w_in = scale * jax.random.normal(ks[0], (in_channels, emb_dim), jnp.float32)
    b_in = scale * jax.random.normal(ks[1], (1, emb_dim), jnp.float32)
    wq = scale * jax.random.normal(ks[2], (emb_dim, emb_dim), jnp.float32)
    bq = scale * jax.random.normal(ks[3], (1, emb_dim), jnp.float32)
    wk = scale * jax.random.normal(ks[4], (emb_dim, emb_dim), jnp.float32)
    bk = scale * jax.random.normal(ks[5], (1, emb_dim), jnp.float32)
    wv = scale * jax.random.normal(ks[6], (emb_dim, emb_dim), jnp.float32)
    bv = scale * jax.random.normal(ks[7], (1, emb_dim), jnp.float32)
    w_out = scale * jax.random.normal(ks[8], (emb_dim, in_channels), jnp.float32)
    b_out = scale * jax.random.normal(ks[9], (1, in_channels), jnp.float32)
    return (w_in, b_in, wq, bq, wk, bk, wv, bv, w_out, b_out)


def _reference(x_nchw, context, params, num_heads):
    """Plain-JAX reference mirroring the PyTorch forward (pad_mask=None)."""
    (w_in, b_in, wq, bq, wk, bk, wv, bv, w_out, b_out) = params
    B, C, H, W = x_nchw.shape
    _, S, E = context.shape
    depth = E // num_heads
    scale = float(E) ** (-0.5)
    x = jnp.transpose(x_nchw, (0, 2, 3, 1)).reshape(B, H * W, C)
    xp = x @ w_in + b_in
    q = (xp @ wq + bq).reshape(B, -1, num_heads, depth).transpose(0, 2, 1, 3)
    k = (context @ wk + bk).reshape(B, -1, num_heads, depth).transpose(0, 2, 1, 3)
    v = (context @ wv + bv).reshape(B, -1, num_heads, depth).transpose(0, 2, 1, 3)
    att = jnp.einsum('bnid,bnjd->bnij', q, k) * scale
    att = jax.nn.softmax(att, axis=-1)
    o = jnp.einsum('bnij,bnjd->bnid', att, v)
    o = o.transpose(0, 2, 1, 3).reshape(B, -1, E)
    o = o @ w_out + b_out
    o = jnp.transpose(o.reshape(B, H, W, C), (0, 3, 1, 2))
    return o, att


if __name__ == "__main__":
    B, C, H, W = 2, 4, 16, 16
    E, NUM_HEADS, S = 32, 4, 8

    key = jax.random.PRNGKey(0)
    kx, kc, kp = jax.random.split(key, 3)
    x = jax.random.normal(kx, (B, C, H, W), jnp.float32)
    context = jax.random.normal(kc, (B, S, E), jnp.float32)
    params = _make_params(kp, C, E)

    out, att = cross_multi_attention(x, context, params, NUM_HEADS)
    out = jax.block_until_ready(out)
    att = jax.block_until_ready(att)

    out_ref, att_ref = _reference(x, context, params, NUM_HEADS)
    assert out.shape == (B, C, H, W)
    assert att.shape == (B, NUM_HEADS, H * W, S)
    assert jnp.allclose(out, out_ref, atol=1e-4, rtol=1e-4)
    assert jnp.allclose(att, att_ref, atol=1e-5, rtol=1e-4)

    print("KERNEL_OK")
</pallas_src>

<mosaic_0001>
module attributes {stable_mosaic.version = 11 : i64} {
  func.func @_cross_attn_kernel(%arg0: i32, %arg1: memref<1x8x256xf32, #tpu.memory_space<vmem>>, %arg2: memref<2x8x32xf32, #tpu.memory_space<vmem>>, %arg3: memref<64x8xf32, #tpu.memory_space<vmem>>, %arg4: memref<64x1xf32, #tpu.memory_space<vmem>>, %arg5: memref<32x32xf32, #tpu.memory_space<vmem>>, %arg6: memref<1x32xf32, #tpu.memory_space<vmem>>, %arg7: memref<32x32xf32, #tpu.memory_space<vmem>>, %arg8: memref<1x32xf32, #tpu.memory_space<vmem>>, %arg9: memref<32x4xf32, #tpu.memory_space<vmem>>, %arg10: memref<8x1xf32, #tpu.memory_space<vmem>>, %arg11: memref<32x32xf32, #tpu.memory_space<vmem>>, %arg12: memref<1x8x256xf32, #tpu.memory_space<vmem>>, %arg13: memref<2x4x8x256xf32, #tpu.memory_space<vmem>>) attributes {dimension_semantics = [#tpu.dimension_semantics<parallel>], iteration_bounds = array<i64: 1>, scalar_prefetch = 0 : i64, scratch_operands = 0 : i64, tpu.core_type = #tpu.core_type<tc>, window_params = [{transform_indices = @transform_0, window_bounds = array<i64: 1, 8, 256>}, {transform_indices = @transform_1, window_bounds = array<i64: 2, 8, 32>}, {pipeline_mode = #tpu.pipeline_mode<synchronous>, transform_indices = @transform_2, window_bounds = array<i64: 64, 8>}, {pipeline_mode = #tpu.pipeline_mode<synchronous>, transform_indices = @transform_3, window_bounds = array<i64: 64, 1>}, {pipeline_mode = #tpu.pipeline_mode<synchronous>, transform_indices = @transform_4, window_bounds = array<i64: 32, 32>}, {pipeline_mode = #tpu.pipeline_mode<synchronous>, transform_indices = @transform_5, window_bounds = array<i64: 1, 32>}, {pipeline_mode = #tpu.pipeline_mode<synchronous>, transform_indices = @transform_6, window_bounds = array<i64: 32, 32>}, {pipeline_mode = #tpu.pipeline_mode<synchronous>, transform_indices = @transform_7, window_bounds = array<i64: 1, 32>}, {pipeline_mode = #tpu.pipeline_mode<synchronous>, transform_indices = @transform_8, window_bounds = array<i64: 32, 4>}, {pipeline_mode = #tpu.pipeline_mode<synchronous>, transform_indices = @transform_9, window_bounds = array<i64: 8, 1>}, {pipeline_mode = #tpu.pipeline_mode<synchronous>, transform_indices = @transform_10, window_bounds = array<i64: 32, 32>}, {transform_indices = @transform_11, window_bounds = array<i64: 1, 8, 256>}, {transform_indices = @transform_12, window_bounds = array<i64: 2, 4, 8, 256>}]} {
    %c0 = arith.constant 0 : index
    %c0_0 = arith.constant 0 : index
    %c0_1 = arith.constant 0 : index
    %0 = vector.load %arg1[%c0, %c0_0, %c0_1] : memref<1x8x256xf32, #tpu.memory_space<vmem>>, vector<1x8x256xf32>
    %1 = vector.shape_cast %0 : vector<1x8x256xf32> to vector<8x256xf32>
    %c0_2 = arith.constant 0 : index
    %c0_3 = arith.constant 0 : index
    %2 = vector.load %arg11[%c0_2, %c0_3] : memref<32x32xf32, #tpu.memory_space<vmem>>, vector<32x32xf32>
    %c0_4 = arith.constant 0 : index
    %c0_5 = arith.constant 0 : index
    %3 = vector.load %arg3[%c0_4, %c0_5] : memref<64x8xf32, #tpu.memory_space<vmem>>, vector<64x8xf32>
    %cst = arith.constant dense<0.000000e+00> : vector<64x256xf32>
    %4 = tpu.matmul %3, %1, %cst {dimension_numbers = #tpu.dot_dimension_numbers<[1], [0], [0], [1], [0, 0, 1, 1], [], []>} : vector<64x8xf32>, vector<8x256xf32>, vector<64x256xf32> -> vector<64x256xf32>
    %c0_6 = arith.constant 0 : index
    %c0_7 = arith.constant 0 : index
    %5 = vector.load %arg4[%c0_6, %c0_7] : memref<64x1xf32, #tpu.memory_space<vmem>>, vector<64x1xf32>
    %6 = vector.broadcast %5 : vector<64x1xf32> to vector<64x256xf32>
    %7 = arith.addf %4, %6 : vector<64x256xf32>
    %c0_8 = arith.constant 0 : index
    %c0_9 = arith.constant 0 : index
    %c0_10 = arith.constant 0 : index
    %8 = vector.load %arg2[%c0_8, %c0_9, %c0_10] : memref<2x8x32xf32, #tpu.memory_space<vmem>>, vector<1x8x32xf32>
    %9 = vector.shape_cast %8 : vector<1x8x32xf32> to vector<8x32xf32>
    %10 = vector.extract_strided_slice %7 {offsets = [0, 0], sizes = [32, 256], strides = [1, 1]} : vector<64x256xf32> to vector<32x256xf32>
    %c0_11 = arith.constant 0 : index
    %c0_12 = arith.constant 0 : index
    %11 = vector.load %arg5[%c0_11, %c0_12] : memref<32x32xf32, #tpu.memory_space<vmem>>, vector<32x32xf32>
    %cst_13 = arith.constant dense<0.000000e+00> : vector<8x32xf32>
    %12 = tpu.matmul %9, %11, %cst_13 {dimension_numbers = #tpu.dot_dimension_numbers<[1], [0], [0], [1], [0, 0, 1, 1], [], []>} : vector<8x32xf32>, vector<32x32xf32>, vector<8x32xf32> -> vector<8x32xf32>
    %c0_14 = arith.constant 0 : index
    %c0_15 = arith.constant 0 : index
    %13 = vector.load %arg6[%c0_14, %c0_15] : memref<1x32xf32, #tpu.memory_space<vmem>>, vector<1x32xf32>
    %14 = vector.broadcast %13 : vector<1x32xf32> to vector<8x32xf32>
    %15 = arith.addf %12, %14 : vector<8x32xf32>
    %c0_16 = arith.constant 0 : index
    %c0_17 = arith.constant 0 : index
    %16 = vector.load %arg7[%c0_16, %c0_17] : memref<32x32xf32, #tpu.memory_space<vmem>>, vector<32x32xf32>
    %cst_18 = arith.constant dense<0.000000e+00> : vector<8x32xf32>
    %17 = tpu.matmul %9, %16, %cst_18 {dimension_numbers = #tpu.dot_dimension_numbers<[1], [0], [0], [1], [0, 0, 1, 1], [], []>} : vector<8x32xf32>, vector<32x32xf32>, vector<8x32xf32> -> vector<8x32xf32>
    %c0_19 = arith.constant 0 : index
    %c0_20 = arith.constant 0 : index
    %18 = vector.load %arg8[%c0_19, %c0_20] : memref<1x32xf32, #tpu.memory_space<vmem>>, vector<1x32xf32>
    %19 = vector.broadcast %18 : vector<1x32xf32> to vector<8x32xf32>
    %20 = arith.addf %17, %19 : vector<8x32xf32>
    %21 = tpu.concatenate %15, %15, %15, %15 in 0 : vector<8x32xf32>, vector<8x32xf32>, vector<8x32xf32>, vector<8x32xf32> -> vector<32x32xf32>
    %22 = arith.mulf %21, %2 : vector<32x32xf32>
    %cst_21 = arith.constant dense<0.000000e+00> : vector<32x256xf32>
    %23 = tpu.matmul %22, %10, %cst_21 {dimension_numbers = #tpu.dot_dimension_numbers<[1], [0], [0], [1], [0, 0, 1, 1], [], []>} : vector<32x32xf32>, vector<32x256xf32>, vector<32x256xf32> -> vector<32x256xf32>
    %24 = vector.shape_cast %23 : vector<32x256xf32> to vector<4x8x256xf32>
    %cst_22 = arith.constant dense<0xFF800000> : vector<4x256xf32>
    %25 = vector.multi_reduction <maximumf>, %24, %cst_22 [1] : vector<4x8x256xf32> to vector<4x256xf32>
    %26 = vector.shape_cast %25 : vector<4x256xf32> to vector<4x1x256xf32>
    %27 = vector.broadcast %26 : vector<4x1x256xf32> to vector<4x8x256xf32>
    %28 = arith.subf %24, %27 : vector<4x8x256xf32>
    %29 = math.exp %28 : vector<4x8x256xf32>
    %cst_23 = arith.constant dense<0.000000e+00> : vector<4x256xf32>
    %30 = vector.multi_reduction <add>, %29, %cst_23 [1] : vector<4x8x256xf32> to vector<4x256xf32>
    %31 = vector.shape_cast %30 : vector<4x256xf32> to vector<4x1x256xf32>
    %32 = tpu.reciprocal %31 : vector<4x1x256xf32> -> vector<4x1x256xf32>
    %33 = vector.broadcast %32 : vector<4x1x256xf32> to vector<4x8x256xf32>
    %34 = arith.mulf %29, %33 : vector<4x8x256xf32>
    %c0_24 = arith.constant 0 : index
    %c0_25 = arith.constant 0 : index
    %c0_26 = arith.constant 0 : index
    %c0_27 = arith.constant 0 : index
    %35 = vector.load %arg13[%c0_24, %c0_25, %c0_26, %c0_27] : memref<2x4x8x256xf32, #tpu.memory_space<vmem>>, vector<1x4x8x256xf32>
    %36 = vector.shape_cast %35 : vector<1x4x8x256xf32> to vector<4x8x256xf32>
    %37 = vector.shape_cast %34 : vector<4x8x256xf32> to vector<1x4x8x256xf32>
    tpu.vector_store %arg13[%c0_24, %c0_25, %c0_26, %c0_27], %37 {strides = array<i32>} : memref<2x4x8x256xf32, #tpu.memory_space<vmem>>, vector<1x4x8x256xf32>,
    %38 = tpu.concatenate %20, %20, %20, %20 in 0 : vector<8x32xf32>, vector<8x32xf32>, vector<8x32xf32>, vector<8x32xf32> -> vector<32x32xf32>
    %39 = arith.mulf %38, %2 : vector<32x32xf32>
    %c0_28 = arith.constant 0 : index
    %c0_29 = arith.constant 0 : index
    %40 = vector.load %arg9[%c0_28, %c0_29] : memref<32x4xf32, #tpu.memory_space<vmem>>, vector<32x4xf32>
    %cst_30 = arith.constant dense<0.000000e+00> : vector<32x4xf32>
    %41 = tpu.matmul %39, %40, %cst_30 {dimension_numbers = #tpu.dot_dimension_numbers<[1], [0], [0], [1], [0, 0, 1, 1], [], []>} : vector<32x32xf32>, vector<32x4xf32>, vector<32x4xf32> -> vector<32x4xf32>
    %42 = tpu.transpose %41, [1, 0] : vector<32x4xf32> -> vector<4x32xf32>
    %43 = vector.shape_cast %34 : vector<4x8x256xf32> to vector<32x256xf32>
    %cst_31 = arith.constant dense<0.000000e+00> : vector<4x256xf32>
    %44 = tpu.matmul %42, %43, %cst_31 {dimension_numbers = #tpu.dot_dimension_numbers<[1], [0], [0], [1], [0, 0, 1, 1], [], []>} : vector<4x32xf32>, vector<32x256xf32>, vector<4x256xf32> -> vector<4x256xf32>
    %c1 = arith.constant 1 : index
    %c0_32 = arith.constant 0 : index
    %c0_33 = arith.constant 0 : index
    %45 = vector.load %arg2[%c1, %c0_32, %c0_33] : memref<2x8x32xf32, #tpu.memory_space<vmem>>, vector<1x8x32xf32>
    %46 = vector.shape_cast %45 : vector<1x8x32xf32> to vector<8x32xf32>
    %47 = vector.extract_strided_slice %7 {offsets = [32, 0], sizes = [32, 256], strides = [1, 1]} : vector<64x256xf32> to vector<32x256xf32>
    %c0_34 = arith.constant 0 : index
    %c0_35 = arith.constant 0 : index
    %48 = vector.load %arg5[%c0_34, %c0_35] : memref<32x32xf32, #tpu.memory_space<vmem>>, vector<32x32xf32>
    %cst_36 = arith.constant dense<0.000000e+00> : vector<8x32xf32>
    %49 = tpu.matmul %46, %48, %cst_36 {dimension_numbers = #tpu.dot_dimension_numbers<[1], [0], [0], [1], [0, 0, 1, 1], [], []>} : vector<8x32xf32>, vector<32x32xf32>, vector<8x32xf32> -> vector<8x32xf32>
    %c0_37 = arith.constant 0 : index
    %c0_38 = arith.constant 0 : index
    %50 = vector.load %arg6[%c0_37, %c0_38] : memref<1x32xf32, #tpu.memory_space<vmem>>, vector<1x32xf32>
    %51 = vector.broadcast %50 : vector<1x32xf32> to vector<8x32xf32>
    %52 = arith.addf %49, %51 : vector<8x32xf32>
    %c0_39 = arith.constant 0 : index
    %c0_40 = arith.constant 0 : index
    %53 = vector.load %arg7[%c0_39, %c0_40] : memref<32x32xf32, #tpu.memory_space<vmem>>, vector<32x32xf32>
    %cst_41 = arith.constant dense<0.000000e+00> : vector<8x32xf32>
    %54 = tpu.matmul %46, %53, %cst_41 {dimension_numbers = #tpu.dot_dimension_numbers<[1], [0], [0], [1], [0, 0, 1, 1], [], []>} : vector<8x32xf32>, vector<32x32xf32>, vector<8x32xf32> -> vector<8x32xf32>
    %c0_42 = arith.constant 0 : index
    %c0_43 = arith.constant 0 : index
    %55 = vector.load %arg8[%c0_42, %c0_43] : memref<1x32xf32, #tpu.memory_space<vmem>>, vector<1x32xf32>
    %56 = vector.broadcast %55 : vector<1x32xf32> to vector<8x32xf32>
    %57 = arith.addf %54, %56 : vector<8x32xf32>
    %58 = tpu.concatenate %52, %52, %52, %52 in 0 : vector<8x32xf32>, vector<8x32xf32>, vector<8x32xf32>, vector<8x32xf32> -> vector<32x32xf32>
    %59 = arith.mulf %58, %2 : vector<32x32xf32>
    %cst_44 = arith.constant dense<0.000000e+00> : vector<32x256xf32>
    %60 = tpu.matmul %59, %47, %cst_44 {dimension_numbers = #tpu.dot_dimension_numbers<[1], [0], [0], [1], [0, 0, 1, 1], [], []>} : vector<32x32xf32>, vector<32x256xf32>, vector<32x256xf32> -> vector<32x256xf32>
    %61 = vector.shape_cast %60 : vector<32x256xf32> to vector<4x8x256xf32>
    %cst_45 = arith.constant dense<0xFF800000> : vector<4x256xf32>
    %62 = vector.multi_reduction <maximumf>, %61, %cst_45 [1] : vector<4x8x256xf32> to vector<4x256xf32>
    %63 = vector.shape_cast %62 : vector<4x256xf32> to vector<4x1x256xf32>
    %64 = vector.broadcast %63 : vector<4x1x256xf32> to vector<4x8x256xf32>
    %65 = arith.subf %61, %64 : vector<4x8x256xf32>
    %66 = math.exp %65 : vector<4x8x256xf32>
    %cst_46 = arith.constant dense<0.000000e+00> : vector<4x256xf32>
    %67 = vector.multi_reduction <add>, %66, %cst_46 [1] : vector<4x8x256xf32> to vector<4x256xf32>
    %68 = vector.shape_cast %67 : vector<4x256xf32> to vector<4x1x256xf32>
    %69 = tpu.reciprocal %68 : vector<4x1x256xf32> -> vector<4x1x256xf32>
    %70 = vector.broadcast %69 : vector<4x1x256xf32> to vector<4x8x256xf32>
    %71 = arith.mulf %66, %70 : vector<4x8x256xf32>
    %c1_47 = arith.constant 1 : index
    %c0_48 = arith.constant 0 : index
    %c0_49 = arith.constant 0 : index
    %c0_50 = arith.constant 0 : index
    %72 = vector.load %arg13[%c1_47, %c0_48, %c0_49, %c0_50] : memref<2x4x8x256xf32, #tpu.memory_space<vmem>>, vector<1x4x8x256xf32>
    %73 = vector.shape_cast %72 : vector<1x4x8x256xf32> to vector<4x8x256xf32>
    %74 = vector.shape_cast %71 : vector<4x8x256xf32> to vector<1x4x8x256xf32>
    tpu.vector_store %arg13[%c1_47, %c0_48, %c0_49, %c0_50], %74 {strides = array<i32>} : memref<2x4x8x256xf32, #tpu.memory_space<vmem>>, vector<1x4x8x256xf32>,
    %75 = tpu.concatenate %57, %57, %57, %57 in 0 : vector<8x32xf32>, vector<8x32xf32>, vector<8x32xf32>, vector<8x32xf32> -> vector<32x32xf32>
    %76 = arith.mulf %75, %2 : vector<32x32xf32>
    %c0_51 = arith.constant 0 : index
    %c0_52 = arith.constant 0 : index
    %77 = vector.load %arg9[%c0_51, %c0_52] : memref<32x4xf32, #tpu.memory_space<vmem>>, vector<32x4xf32>
    %cst_53 = arith.constant dense<0.000000e+00> : vector<32x4xf32>
    %78 = tpu.matmul %76, %77, %cst_53 {dimension_numbers = #tpu.dot_dimension_numbers<[1], [0], [0], [1], [0, 0, 1, 1], [], []>} : vector<32x32xf32>, vector<32x4xf32>, vector<32x4xf32> -> vector<32x4xf32>
    %79 = tpu.transpose %78, [1, 0] : vector<32x4xf32> -> vector<4x32xf32>
    %80 = vector.shape_cast %71 : vector<4x8x256xf32> to vector<32x256xf32>
    %cst_54 = arith.constant dense<0.000000e+00> : vector<4x256xf32>
    %81 = tpu.matmul %79, %80, %cst_54 {dimension_numbers = #tpu.dot_dimension_numbers<[1], [0], [0], [1], [0, 0, 1, 1], [], []>} : vector<4x32xf32>, vector<32x256xf32>, vector<4x256xf32> -> vector<4x256xf32>
    %82 = tpu.concatenate %44, %81 in 0 : vector<4x256xf32>, vector<4x256xf32> -> vector<8x256xf32>
    %c0_55 = arith.constant 0 : index
    %c0_56 = arith.constant 0 : index
    %83 = vector.load %arg10[%c0_55, %c0_56] : memref<8x1xf32, #tpu.memory_space<vmem>>, vector<8x1xf32>
    %84 = vector.broadcast %83 : vector<8x1xf32> to vector<8x256xf32>
    %85 = arith.addf %82, %84 : vector<8x256xf32>
    %c0_57 = arith.constant 0 : index
    %c0_58 = arith.constant 0 : index
    %c0_59 = arith.constant 0 : index
    %86 = vector.load %arg12[%c0_57, %c0_58, %c0_59] : memref<1x8x256xf32, #tpu.memory_space<vmem>>, vector<1x8x256xf32>
    %87 = vector.shape_cast %86 : vector<1x8x256xf32> to vector<8x256xf32>
    %88 = vector.shape_cast %85 : vector<8x256xf32> to vector<1x8x256xf32>
    tpu.vector_store %arg12[%c0_57, %c0_58, %c0_59], %88 {strides = array<i32>} : memref<1x8x256xf32, #tpu.memory_space<vmem>>, vector<1x8x256xf32>,
    return
  }
  func.func @transform_0(%arg0: i32) -> (i32, i32, i32) {
    %c0_i32 = arith.constant 0 : i32
    %c0_i32_0 = arith.constant 0 : i32
    %c0_i32_1 = arith.constant 0 : i32
    return %arg0, %c0_i32, %c0_i32_0 : i32, i32, i32
  }
  func.func @transform_1(%arg0: i32) -> (i32, i32, i32) {
    %c0_i32 = arith.constant 0 : i32
    %c0_i32_0 = arith.constant 0 : i32
    %c0_i32_1 = arith.constant 0 : i32
    return %arg0, %c0_i32, %c0_i32_0 : i32, i32, i32
  }
  func.func @transform_2(%arg0: i32) -> (i32, i32) {
    %c0_i32 = arith.constant 0 : i32
    %c0_i32_0 = arith.constant 0 : i32
    %c0_i32_1 = arith.constant 0 : i32
    return %c0_i32, %c0_i32_0 : i32, i32
  }
  func.func @transform_3(%arg0: i32) -> (i32, i32) {
    %c0_i32 = arith.constant 0 : i32
    %c0_i32_0 = arith.constant 0 : i32
    %c0_i32_1 = arith.constant 0 : i32
    return %c0_i32, %c0_i32_0 : i32, i32
  }
  func.func @transform_4(%arg0: i32) -> (i32, i32) {
    %c0_i32 = arith.constant 0 : i32
    %c0_i32_0 = arith.constant 0 : i32
    %c0_i32_1 = arith.constant 0 : i32
    return %c0_i32, %c0_i32_0 : i32, i32
  }
  func.func @transform_5(%arg0: i32) -> (i32, i32) {
    %c0_i32 = arith.constant 0 : i32
    %c0_i32_0 = arith.constant 0 : i32
    %c0_i32_1 = arith.constant 0 : i32
    return %c0_i32, %c0_i32_0 : i32, i32
  }
  func.func @transform_6(%arg0: i32) -> (i32, i32) {
    %c0_i32 = arith.constant 0 : i32
    %c0_i32_0 = arith.constant 0 : i32
    %c0_i32_1 = arith.constant 0 : i32
    return %c0_i32, %c0_i32_0 : i32, i32
  }
  func.func @transform_7(%arg0: i32) -> (i32, i32) {
    %c0_i32 = arith.constant 0 : i32
    %c0_i32_0 = arith.constant 0 : i32
    %c0_i32_1 = arith.constant 0 : i32
    return %c0_i32, %c0_i32_0 : i32, i32
  }
  func.func @transform_8(%arg0: i32) -> (i32, i32) {
    %c0_i32 = arith.constant 0 : i32
    %c0_i32_0 = arith.constant 0 : i32
    %c0_i32_1 = arith.constant 0 : i32
    return %c0_i32, %c0_i32_0 : i32, i32
  }
  func.func @transform_9(%arg0: i32) -> (i32, i32) {
    %c0_i32 = arith.constant 0 : i32
    %c0_i32_0 = arith.constant 0 : i32
    %c0_i32_1 = arith.constant 0 : i32
    return %c0_i32, %c0_i32_0 : i32, i32
  }
  func.func @transform_10(%arg0: i32) -> (i32, i32) {
    %c0_i32 = arith.constant 0 : i32
    %c0_i32_0 = arith.constant 0 : i32
    %c0_i32_1 = arith.constant 0 : i32
    return %c0_i32, %c0_i32_0 : i32, i32
  }
  func.func @transform_11(%arg0: i32) -> (i32, i32, i32) {
    %c0_i32 = arith.constant 0 : i32
    %c0_i32_0 = arith.constant 0 : i32
    %c0_i32_1 = arith.constant 0 : i32
    return %arg0, %c0_i32, %c0_i32_0 : i32, i32, i32
  }
  func.func @transform_12(%arg0: i32) -> (i32, i32, i32, i32) {
    %c0_i32 = arith.constant 0 : i32
    %c0_i32_0 = arith.constant 0 : i32
    %c0_i32_1 = arith.constant 0 : i32
    %c0_i32_2 = arith.constant 0 : i32
    return %arg0, %c0_i32, %c0_i32_0, %c0_i32_1 : i32, i32, i32, i32
  }
}

</mosaic_0001>

<bundles_post_ra>
// kernel: tpu_custom_call.1
= control target key start
LH: loop header
LB: loop body
LE: loop exit
PB: predicated region body
PF: predicated region fallthrough
CT: control target
= control target key end

     0   :  { %18 = vsyncpa [#allocation3], 0  ;;  %vm104_vm0 = vcmask 64512   ;;  %v1806_v3 = vmov 0.0   ;;  %vm1807_vm1 = vmmov 0   ;;  %v1808_v9 = vmov 0   ;;  %s2230_s0 = inlined_call_operand.vmem [shape: f32[1,8,256], index: 0, kind: input, shape index: {}]   ;;  %s2231_s1 = inlined_call_operand.vmem [shape: f32[2,8,32], index: 1, kind: input, shape index: {}]   ;;  %s2232_s2 = inlined_call_operand.vmem [shape: f32[64,8], index: 2, kind: input, shape index: {}]   ;;  %s2233_s3 = inlined_call_operand.vmem [shape: f32[64,1], index: 3, kind: input, shape index: {}]   ;;  %s2234_s4 = inlined_call_operand.vmem [shape: f32[32,32], index: 4, kind: input, shape index: {}]   ;;  %s2235_s5 = inlined_call_operand.vmem [shape: f32[1,32], index: 5, kind: input, shape index: {}]   ;;  %s2236_s6 = inlined_call_operand.vmem [shape: f32[32,32], index: 6, kind: input, shape index: {}]   ;;  %s2237_s7 = inlined_call_operand.vmem [shape: f32[1,32], index: 7, kind: input, shape index: {}]   ;;  %s2238_s8 = inlined_call_operand.vmem [shape: f32[32,4], index: 8, kind: input, shape index: {}]   ;;  %s2239_s9 = inlined_call_operand.vmem [shape: f32[8,1], index: 9, kind: input, shape index: {}]   ;;  %s2240_s10 = inlined_call_operand.vmem [shape: f32[32,32], index: 10, kind: input, shape index: {}]   ;;  %s2241_s11 = inlined_call_operand.hbm [shape: f32[1,8,256], index: 11, kind: output, shape index: {0}]   ;;  %s2242_s12 = inlined_call_operand.hbm [shape: f32[2,4,8,256], index: 12, kind: output, shape index: {1}]  }
   0x1   :  { %v43_v0 = vld [vmem:[%s2230_s0 + $0x8] sm:$0xff]  ;;  %v42_v1 = vld [vmem:[%s2230_s0] sm:$0xff]  ;;  %v1887_v2 = vld [vmem:[%s2234_s4 + $0x18] sm:$0xff]  ;;  %1617 = vmatprep.subr.mxu1 %v1806_v3  ;;  %193 = vmatprep.mubr.f32.mxu0 %v1806_v3  ;;  %vm254_vm2 = vcmask 261120  }
   0x2   :  { %159 = vmatprep.subr.mxu0 %v43_v0  ;;  %v48_v4 = vld [vmem:[%s2232_s2] sm:$0xff]  ;;  %v1897_v5 = vld [vmem:[%s2234_s4 + $0x10] sm:$0xff]  ;;  %1618 = vmatpush3.msra.mxu1 %v1887_v2  ;;  %v1906_v6 = vld [vmem:[%s2234_s4 + $0x8] sm:$0xff] }
   0x3   :  { %160 = vmatpush1.msra.mxu0 %v42_v1  ;;  %1619 = vmatprep.subr.mxu1 %v1806_v3  ;;  %v49_v7 = vld [vmem:[%s2232_s2 + $0x8] sm:$0xff]  ;;  %v1918_v8 = vld [vmem:[%s2234_s4] sm:$0xff]  ;;  %v59_v10 = vld [vmem:[%s2233_s3 + $0x18] sm:$0xff] }
   0x4   :  { %1546 = vmatmul.mubr.msk.f32.vlgmr.msra.gmra.mxu0 %vm104_vm0, %v48_v4  ;;  %1620 = vmatpush3.msra.mxu1 %v1897_v5  ;;  %v242_v11 = vld [vmem:[%s2231_s1] sm:$0xff]  ;;  %v1933_v12 = vld [vmem:[%s2236_s6 + $0x18] sm:$0xff]  ;;  %v50_v13 = vld [vmem:[%s2232_s2 + $0x10] sm:$0xff] }
   0x5   :  { %199 = vmatprep.mubr.f32.mxu0 %v1806_v3  ;;  %1625 = vmatprep.mubr.msk.f32.mxu1 %vm1807_vm1, %v1806_v3 }
   0x6   :  { %1621 = vmatprep.subr.mxu1 %v1806_v3  ;;  %1696 = vset.pattern.permute.xlu0 %v1808_v9 }
   0x7   :  { %1622 = vmatpush3.msra.mxu1 %v1906_v6  ;;  %81 = vperm.xlu0 %1696, %v59_v10  }
   0x8   :  { %1547 = vmatmul.mubr.msk.f32.gmra.mxu0 %vm104_vm0, %v49_v7  ;;  %1623 = vmatprep.subr.mxu1 %v1806_v3 }
   0x9   :  { %205 = vmatprep.mubr.f32.mxu0 %v1806_v3  ;;  %1624 = vmatpush3.msra.mxu1 %v1918_v8 }
   0xa   :  { %19 = vsyncpa [#allocation5], 0  ;;  %1626 = vmatmul.mubr.msk.f32.vlgmr.msra.gmra.mxu1 %vm254_vm2, %v242_v11  ;;  %1628 = vmatprep.subr.mxu1 %v1806_v3  ;;  %v1944_v14 = vld [vmem:[%s2236_s6 + $0x10] sm:$0xff]  ;;  %v1953_v15 = vld [vmem:[%s2236_s6 + $0x8] sm:$0xff] }
   0xb   :  { %1629 = vmatpush3.msra.mxu1 %v1933_v12  ;;  %v51_v16 = vld [vmem:[%s2232_s2 + $0x18] sm:$0xff]  ;;  %1636 = vmatprep.mubr.msk.f32.mxu1 %vm1807_vm1, %v1806_v3  ;;  %v1965_v17 = vld [vmem:[%s2236_s6] sm:$0xff]  ;;  %v58_v18 = vld [vmem:[%s2233_s3 + $0x10] sm:$0xff] }
   0xc   :  { %1548 = vmatmul.mubr.msk.f32.gmra.mxu0 %vm104_vm0, %v50_v13  ;;  %1630 = vmatprep.subr.mxu1 %v1806_v3  ;;  %v57_v19 = vld [vmem:[%s2233_s3 + $0x8] sm:$0xff]  ;;  %v52_v20 = vld [vmem:[%s2232_s2 + $0x20] sm:$0xff]  ;;  %v1983_v21 = vld [vmem:[%s2238_s8 + $0x18] sm:$0xff] }
   0xd   :  { %211 = vmatprep.mubr.f32.mxu0 %v1806_v3  ;;  %1631 = vmatpush3.msra.mxu1 %v1944_v14  ;;  %v1990_v22 = vld [vmem:[%s2238_s8 + $0x10] sm:$0xff]  ;;  %v56_v23 = vld [vmem:[%s2233_s3] sm:$0xff]  ;;  %v53_v24 = vld [vmem:[%s2232_s2 + $0x28] sm:$0xff] }
   0xe   :  { %1632 = vmatprep.subr.mxu1 %v1806_v3  ;;  %1697 = vset.pattern.permute.xlu1 %v1808_v9  ;;  %v63_v25 = vld [vmem:[%s2233_s3 + $0x38] sm:$0xff]  ;;  %v54_v26 = vld [vmem:[%s2232_s2 + $0x30] sm:$0xff]  ;;  %v61_v29 = vld [vmem:[%s2233_s3 + $0x28] sm:$0xff] }
   0xf   :  { %1633 = vmatpush3.msra.mxu1 %v1953_v15  ;;  %76 = vperm.xlu0 %1696, %v58_v18   ;;  %v62_v27 = vld [vmem:[%s2233_s3 + $0x30] sm:$0xff]  ;;  %v55_v28 = vld [vmem:[%s2232_s2 + $0x38] sm:$0xff]  ;;  %v60_v30 = vld [vmem:[%s2233_s3 + $0x20] sm:$0xff] }
  0x10   :  { %1549 = vmatmul.mubr.msk.f32.gmra.mxu0 %vm104_vm0, %v51_v16  ;;  %1634 = vmatprep.subr.mxu1 %v1806_v3  ;;  %v2031_v31 = vld [vmem:[%s2238_s8 + $0x8] sm:$0xff]  ;;  %v2038_v32 = vld [vmem:[%s2238_s8] sm:$0xff]  ;;  %v2072_v7 = vld [vmem:[%s2240_s10 + $0x10] sm:$0xff] }
  0x11   :  { %217 = vmatprep.mubr.f32.mxu0 %v1806_v3  ;;  %1635 = vmatpush3.msra.mxu1 %v1965_v17  ;;  %v2046_v46 = vld [vmem:[%s2237_s7] ss:$0 sm:$0xff]  ;;  %v2064_v58 = vld [vmem:[%s2240_s10 + $0x8] sm:$0xff]  ;;  %v2081_v16 = vld [vmem:[%s2240_s10 + $0x18] sm:$0xff] }
  0x12   :  { %1637 = vmatmul.mubr.msk.f32.vlgmr.msra.gmra.mxu1 %vm254_vm2, %v242_v11  ;;  %71 = vperm.xlu1 %1697, %v57_v19   ;;  %v2051_v53 = vld [vmem:[%s2235_s5] ss:$0 sm:$0xff] }
  0x13   :  { %1639 = vmatprep.subr.mxu0 %v1983_v21  ;;  %489 = vmatprep.mubr.f32.mxu1 %v1806_v3  ;;  %v2059_v57 = vld [vmem:[%s2240_s10] sm:$0xff] }
  0x14   :  { %1550 = vmatmul.mubr.msk.f32.gmra.mxu0 %vm104_vm0, %v52_v20 }
  0x15   :  { %223 = vmatprep.mubr.f32.mxu0 %v1806_v3  ;;  %1640 = vmatpush3.msra.mxu0 %v1983_v21 }
  0x16   :  { %1641 = vmatprep.subr.mxu0 %v1990_v22  ;;  %66 = vperm.xlu1 %1697, %v56_v23  }
  0x17   :  { %1642 = vmatpush3.msra.mxu0 %v1990_v22 }
  0x18   :  { %1551 = vmatmul.mubr.msk.f32.gmra.mxu0 %vm104_vm0, %v53_v24  ;;  %1643 = vmatprep.subr.mxu0 %v2031_v31 }
  0x19   :  { %229 = vmatprep.mubr.f32.mxu0 %v1806_v3  ;;  %1644 = vmatpush3.msra.mxu0 %v2031_v31 }
  0x1a   :  { %101 = vperm.xlu1 %1697, %v63_v25   ;;  %1645 = vmatprep.subr.mxu0 %v2038_v32 }
  0x1b   :  { %1646 = vmatpush3.msra.mxu0 %v2038_v32 }
  0x1c   :  { %1552 = vmatmul.mubr.msk.f32.gmra.mxu0 %vm104_vm0, %v54_v26  ;;  %1653 = vmatprep.subr.mxu0 %v1806_v3 }
  0x1d   :  { %235 = vmatprep.mubr.f32.mxu0 %v1806_v3 }
  0x1e   :  { %96 = vperm.xlu1 %1697, %v62_v27   ;;  %v2099_v27 = vld [vmem:[%s2231_s1 + $0x8] sm:$0xff] }
  0x20   :  { %1553 = vmatmul.mubr.msk.f32.gmra.mxu0 %vm104_vm0, %v55_v28 }
  0x22   :  { %91 = vperm.xlu1 %1697, %v61_v29  }
  0x26   :  { %86 = vperm.xlu1 %1697, %v60_v30  }
  0x82   :  { %v82_v38 = vpop.permute.xlu0 %81 }
  0x8a   :  { %v77_v45 = vpop.permute.xlu0 %76 }
  0x8d   :  { %v72_v36 = vpop.permute.xlu1 %71 }
  0x91   :  { %v67_v43 = vpop.permute.xlu1 %66 }
  0x95   :  { %v102_v49 = vpop.permute.xlu1 %101 }
  0x99   :  { %v97_v13 = vpop.permute.xlu1 %96 }
  0x9d   :  { %v92_v25 = vpop.permute.xlu1 %91 }
  0xc4   :  { %v195_v33 = vpop.f32.mrf.mxu0 }
  0xc5   :  { %v196_v9 = vadd.f32 %v195_v33, %v67_v43 }
  0xc6   :  { %v197_v34 = vpop.f32.mrf.mxu0 }
  0xc7   :  { %v198_v4 = vadd.f32 %v197_v34, %v67_v43  ;;  %v87_v34 = vpop.permute.xlu1 %86 }
  0xc8   :  { %v201_v35 = vpop.f32.mrf.mxu0 }
  0xc9   :  { %v202_v62 = vadd.f32 %v201_v35, %v72_v36 }
  0xca   :  { %v203_v37 = vpop.f32.mrf.mxu0  ;;  %v324_v39 = vpop.f32.mrf.mxu1 }
  0xcb   :  { %v204_v60 = vadd.f32 %v203_v37, %v72_v36  ;;  %v325_v1 = vadd.f32 %v2051_v53, %v324_v39 }
  0xcc   :  { %v207_v40 = vpop.f32.mrf.mxu0  ;;  %v1627_v41 = vpop.f32.mrf.mxu1 }
  0xcd   :  { %v208_v55 = vadd.f32 %v207_v40, %v77_v45  ;;  %v409_v19 = vmul.f32 %v325_v1, %v2059_v57  ;;  %v410_v26 = vmul.f32 %v325_v1, %v2064_v58  ;;  %v411_v29 = vmul.f32 %v325_v1, %v2072_v7 }
  0xce   :  { %v209_v42 = vpop.f32.mrf.mxu0 }
  0xcf   :  { %v210_v52 = vadd.f32 %v209_v42, %v77_v45 }
  0xd0   :  { %v213_v44 = vpop.f32.mrf.mxu0 }
  0xd1   :  { %v214_v47 = vadd.f32 %v213_v44, %v82_v38 }
  0xd2   :  { %v215_v48 = vpop.f32.mrf.mxu0  ;;  %v405_v51 = vpop.f32.mrf.mxu1 }
  0xd3   :  { %v216_v50 = vadd.f32 %v215_v48, %v82_v38  ;;  %v406_v54 = vadd.f32 %v2046_v46, %v405_v51 }
  0xd4   :  { %v2054_v56 = vpop.f32.mrf.mxu0  ;;  %v1638_v59 = vpop.f32.mrf.mxu1 }
  0xd5   :  { %449 = vmatprep.subr.mxu1 %v216_v50  ;;  %v659_v61 = vmul.f32 %v406_v54, %v2064_v58  ;;  %v658_v63 = vmul.f32 %v406_v54, %v2059_v57  ;;  %v660_v10 = vmul.f32 %v406_v54, %v2072_v7  ;;  %v661_v20 = vmul.f32 %v406_v54, %v2081_v16 }
  0xd6   :  { %450 = vmatpush1.msra.mxu1 %v214_v47  ;;  %v221_v0 = vpop.f32.mrf.mxu0  ;;  %v220_v38 = vadd.f32 %v2054_v56, %v87_v34 }
  0xd7   :  { %451 = vmatprep.subr.mxu1 %v210_v52  ;;  %1647 = vmatprep.mubr.msk.f32.mxu0 %vm254_vm2, %v658_v63  ;;  %v222_v37 = vadd.f32 %v221_v0, %v87_v34 }
  0xd8   :  { %452 = vmatpush1.msra.mxu1 %v208_v55  ;;  %v225_v11 = vpop.f32.mrf.mxu0  ;;  %1648 = vmatmul.mubr.msk.f32.vlgmr.msra.gmra.mxu0 %vm254_vm2, %v659_v61 }
  0xd9   :  { %453 = vmatprep.subr.mxu1 %v204_v60  ;;  %1650 = vmatprep.mubr.msk.f32.mxu0 %vm254_vm2, %v660_v10  ;;  %v226_v36 = vadd.f32 %v225_v11, %v92_v25 }
  0xda   :  { %454 = vmatpush1.msra.mxu1 %v202_v62  ;;  %v227_v18 = vpop.f32.mrf.mxu0  ;;  %1654 = vmatpush3.msra.mxu0 %v1887_v2 }
  0xdb   :  { %455 = vmatprep.subr.mxu1 %v198_v4  ;;  %1655 = vmatprep.subr.mxu0 %v1806_v3  ;;  %v228_v35 = vadd.f32 %v227_v18, %v92_v25 }
  0xdc   :  { %456 = vmatpush1.msra.mxu1 %v196_v9  ;;  %v231_v23 = vpop.f32.mrf.mxu0  ;;  %1651 = vmatmul.mubr.msk.f32.gmra.mxu0 %vm254_vm2, %v661_v20 }
  0xdd   :  { %1558 = vmatmul.mubr.msk.f32.vlgmr.msra.gmra.mxu1 %vm254_vm2, %v409_v19  ;;  %1656 = vmatpush3.msra.mxu0 %v1897_v5 }
  0xde   :  { %495 = vmatprep.mubr.f32.mxu1 %v1806_v3  ;;  %v233_v24 = vpop.f32.mrf.mxu0  ;;  %1657 = vmatprep.subr.mxu0 %v1806_v3 }
  0xdf   :  { %1661 = vmatprep.mubr.msk.f32.mxu0 %vm1807_vm1, %v1806_v3  ;;  %1658 = vmatpush3.msra.mxu0 %v1906_v6  ;;  %v234_v30 = vadd.f32 %v233_v24, %v97_v13  ;;  %v232_v6 = vadd.f32 %v231_v23, %v97_v13 }
  0xe0   :  { %v237_v2 = vpop.f32.mrf.mxu0  ;;  %1659 = vmatprep.subr.mxu0 %v1806_v3 }
  0xe1   :  { %1559 = vmatmul.mubr.msk.f32.gmra.mxu1 %vm254_vm2, %v410_v26  ;;  %v238_v5 = vadd.f32 %v237_v2, %v102_v49  ;;  %1660 = vmatpush3.msra.mxu0 %v1918_v8  ;;  %v412_v8 = vmul.f32 %v325_v1, %v2081_v16 }
  0xe2   :  { %501 = vmatprep.mubr.f32.mxu1 %v1806_v3  ;;  %v239_v28 = vpop.f32.mrf.mxu0  ;;  %1662 = vmatmul.mubr.msk.f32.vlgmr.msra.gmra.mxu0 %vm254_vm2, %v2099_v27 }
  0xe3   :  { %v240_v33 = vadd.f32 %v239_v28, %v102_v49  ;;  %1116 = vmatprep.mubr.f32.mxu0 %v1806_v3 }
  0xe5   :  { %1560 = vmatmul.mubr.msk.f32.gmra.mxu1 %vm254_vm2, %v411_v29  ;;  %1076 = vmatprep.subr.mxu0 %v240_v33 }
  0xe6   :  { %507 = vmatprep.mubr.f32.mxu1 %v1806_v3  ;;  %1077 = vmatpush1.msra.mxu0 %v238_v5 }
  0xe7   :  { %1078 = vmatprep.subr.mxu0 %v234_v30 }
  0xe8   :  { %1079 = vmatpush1.msra.mxu0 %v232_v6 }
  0xe9   :  { %1561 = vmatmul.mubr.msk.f32.gmra.mxu1 %vm254_vm2, %v412_v8  ;;  %1080 = vmatprep.subr.mxu0 %v228_v35 }
  0xea   :  { %1081 = vmatpush1.msra.mxu0 %v226_v36  ;;  %862 = vmatprep.mubr.f32.mxu1 %v1806_v3 }
  0xeb   :  { %1082 = vmatprep.subr.mxu0 %v222_v37 }
  0xec   :  { %1083 = vmatpush1.msra.mxu0 %v220_v38 }
 0x198   :  { %v1649_v39 = vpop.f32.mrf.mxu0 }
 0x19a   :  { %v744_v40 = vpop.f32.mrf.mxu0 }
 0x19b   :  { %763 = vxpose.xlu0.b32.start [1/4] (short) (narrow) %v744_v40, 8 }
 0x19c   :  { %v1652_v43 = vpop.f32.mrf.mxu0 }
 0x19d   :  { %v491_v41 = vpop.f32.mrf.mxu1 }
 0x19e   :  { %v514_v42 = vrot.slane %v491_v41, 4  ;;  %v754_v52 = vpop.f32.mrf.mxu0 }
 0x19f   :  { %v493_v44 = vpop.f32.mrf.mxu1  ;;  %764 = vxpose.xlu0.b32.cont [2/4] (short) (narrow) %v1649_v39, 8 }
 0x1a0   :  { %v515_v45 = vmax.f32 %v491_v41, %v514_v42  ;;  %v520_v47 = vrot.slane %v493_v44, 4 }
 0x1a1   :  { %v497_v48 = vpop.f32.mrf.mxu1 }
 0x1a2   :  { %v516_v49 = vrot.slane %v515_v45, 2  ;;  %v521_v50 = vmax.f32 %v493_v44, %v520_v47  ;;  %v526_v51 = vrot.slane %v497_v48, 4 }
 0x1a3   :  { %v499_v54 = vpop.f32.mrf.mxu1  ;;  %765 = vxpose.xlu0.b32.cont [3/4] (short) (narrow) %v754_v52, 8 }
 0x1a4   :  { %v517_v55 = vmax.f32 %v515_v45, %v516_v49  ;;  %v522_v56 = vrot.slane %v521_v50, 2  ;;  %v527_v59 = vmax.f32 %v497_v48, %v526_v51  ;;  %v532_v60 = vrot.slane %v499_v54, 4 }
 0x1a5   :  { %v503_v61 = vpop.f32.mrf.mxu1 }
 0x1a6   :  { %v518_v62 = vrot.slane %v517_v55, 1  ;;  %v523_v63 = vmax.f32 %v521_v50, %v522_v56  ;;  %v528_v0 = vrot.slane %v527_v59, 2  ;;  %v533_v1 = vmax.f32 %v499_v54, %v532_v60 }
 0x1a7   :  { %v538_v4 = vrot.slane %v503_v61, 4  ;;  %v505_v9 = vpop.f32.mrf.mxu1  ;;  %766 = vxpose.xlu0.b32.end [4/4] (short) (narrow) %v1652_v43, 8 }
 0x1a8   :  { %v519_v10 = vmax.f32 %v517_v55, %v518_v62  ;;  %v524_v11 = vrot.slane %v523_v63, 1  ;;  %v529_v13 = vmax.f32 %v527_v59, %v528_v0  ;;  %v534_v18 = vrot.slane %v533_v1, 2 }
 0x1a9   :  { %v539_v19 = vmax.f32 %v503_v61, %v538_v4  ;;  %v544_v20 = vrot.slane %v505_v9, 4  ;;  %v509_v23 = vpop.f32.mrf.mxu1 }
 0x1aa   :  { %v562_v24 = vsub.f32 %v491_v41, %v519_v10  ;;  %v525_v25 = vmax.f32 %v523_v63, %v524_v11  ;;  %v530_v26 = vrot.slane %v529_v13, 1  ;;  %v535_v2 = vmax.f32 %v533_v1, %v534_v18 }
 0x1ab   :  { %v540_v5 = vrot.slane %v539_v19, 2  ;;  %v545_v28 = vmax.f32 %v505_v9, %v544_v20  ;;  %v550_v29 = vrot.slane %v509_v23, 4  ;;  %v511_v30 = vpop.f32.mrf.mxu1 }
 0x1ac   :  { %v570_v33 = vmul.f32 1.442695, %v562_v24  ;;  %v563_v6 = vsub.f32 %v493_v44, %v525_v25  ;;  %v531_v34 = vmax.f32 %v529_v13, %v530_v26  ;;  %v536_v35 = vrot.slane %v535_v2, 1 }
 0x1ad   :  { %v541_v36 = vmax.f32 %v539_v19, %v540_v5  ;;  %v546_v8 = vrot.slane %v545_v28, 2  ;;  %v551_v37 = vmax.f32 %v509_v23, %v550_v29  ;;  %v556_v38 = vrot.slane %v511_v30, 4 }
 0x1ae   :  { %1698 = vpow2.f32 %v570_v33  ;;  %v572_v39 = vmul.f32 1.442695, %v563_v6  ;;  %v564_v40 = vsub.f32 %v497_v48, %v531_v34  ;;  %v537_v42 = vmax.f32 %v535_v2, %v536_v35 }
 0x1af   :  { %v542_v41 = vrot.slane %v541_v36, 1  ;;  %v547_v43 = vmax.f32 %v545_v28, %v546_v8  ;;  %v552_v45 = vrot.slane %v551_v37, 2  ;;  %v557_v47 = vmax.f32 %v511_v30, %v556_v38 }
 0x1b0   :  { %1700 = vpow2.f32 %v572_v39  ;;  %v574_v49 = vmul.f32 1.442695, %v564_v40  ;;  %v565_v50 = vsub.f32 %v499_v54, %v537_v42 }
 0x1b1   :  { %v543_v51 = vmax.f32 %v541_v36, %v542_v41  ;;  %v548_v52 = vrot.slane %v547_v43, 1  ;;  %v553_v44 = vmax.f32 %v551_v37, %v552_v45  ;;  %v558_v55 = vrot.slane %v557_v47, 2 }
 0x1b2   :  { %1702 = vpow2.f32 %v574_v49  ;;  %v576_v56 = vmul.f32 1.442695, %v565_v50 }
 0x1b3   :  { %v566_v59 = vsub.f32 %v503_v61, %v543_v51  ;;  %v549_v60 = vmax.f32 %v547_v43, %v548_v52  ;;  %v554_v62 = vrot.slane %v553_v44, 1  ;;  %v559_v63 = vmax.f32 %v557_v47, %v558_v55 }
 0x1b4   :  { %1704 = vpow2.f32 %v576_v56 }
 0x1b5   :  { %v578_v48 = vmul.f32 1.442695, %v566_v59  ;;  %v567_v0 = vsub.f32 %v505_v9, %v549_v60  ;;  %v555_v1 = vmax.f32 %v553_v44, %v554_v62  ;;  %v560_v4 = vrot.slane %v559_v63, 1 }
 0x1b7   :  { %1706 = vpow2.f32 %v578_v48  ;;  %v580_v10 = vmul.f32 1.442695, %v567_v0  ;;  %v568_v11 = vsub.f32 %v509_v23, %v555_v1  ;;  %v561_v13 = vmax.f32 %v559_v63, %v560_v4 }
 0x1b9   :  { %1708 = vpow2.f32 %v580_v10  ;;  %v582_v54 = vmul.f32 1.442695, %v568_v11  ;;  %v569_v18 = vsub.f32 %v511_v30, %v561_v13  ;;  %v951_v10 = vpop.f32.mrf.mxu0 }
 0x1bb   :  { %v2115_v19 = vpop.eup %1698  ;;  %1710 = vpow2.f32 %v582_v54  ;;  %v584_v20 = vmul.f32 1.442695, %v569_v18 }
 0x1bc   :  { %v586_v61 = vrot.slane %v2115_v19, 4 }
 0x1bd   :  { %v2118_v24 = vpop.eup %1700  ;;  %1712 = vpow2.f32 %v584_v20  ;;  %v1506_v20 = vld [vmem:[%s2239_s9] sm:$0xff]  ;;  %s1809_s9 = smov [#allocation4]  }
 0x1be   :  { %v592_v9 = vrot.slane %v2118_v24, 4  ;;  %v587_v25 = vadd.f32 %v2115_v19, %v586_v61  ;;  %v2147_v61 = vadd.f32 %v2051_v53, %v951_v10  ;;  %s1531_s30 = sshll.u32 %s1809_s9, 4  ;;  %s1532_s30 = int_to_ptr.vmem [resolvable:$true] %s1531_s30 }
 0x1bf   :  { %v2122_v26 = vpop.eup %1702  ;;  %s1762_s0 = scalar_lea.vmem %s1532_s30, 2048  ;;  %p1767_p1 = scmp.lt.s32.totalorder %s1532_s30, %s1532_s30 }
 0x1c0   :  { %v598_v23 = vrot.slane %v2122_v26, 4  ;;  %v593_v2 = vadd.f32 %v2118_v24, %v592_v9  ;;  %v588_v5 = vrot.slane %v587_v25, 2  ;;  %v1663_v9 = vpop.f32.mrf.mxu0  ;;  %p1763_p0 = scmp.ne.s32.totalorder %s1532_s30, %s1762_s0  ;;  %p1768_p2 = scmp.lt.s32.totalorder %s1762_s0, %s1762_s0 }
 0x1c1   :  { %v2126_v28 = vpop.eup %1704 }
 0x1c2   :  { %v604_v29 = vrot.slane %v2126_v28, 4  ;;  %v599_v30 = vadd.f32 %v2122_v26, %v598_v23  ;;  %v594_v33 = vrot.slane %v593_v2, 2  ;;  %v589_v6 = vadd.f32 %v588_v5, %v587_v25  ;;  %p1769_p3 = por %p1768_p2, %p1767_p1 }
 0x1c4   :  { %v2130_v34 = vpop.eup %1706  ;;  %v605_v35 = vadd.f32 %v2126_v28, %v604_v29  ;;  %v600_v36 = vrot.slane %v599_v30, 2  ;;  %v595_v8 = vadd.f32 %v594_v33, %v593_v2  ;;  %v590_v37 = vrot.slane %v589_v6, 1  ;;  %p1770_p4 = pnand %p1769_p3, %p1763_p0 }
 0x1c5   :  { %v610_v38 = vrot.slane %v2130_v34, 4  ;;  %v1036_v29 = vmul.f32 %v2147_v61, %v2059_v57 }
 0x1c6   :  { %v2134_v39 = vpop.eup %1708  ;;  %v606_v40 = vrot.slane %v605_v35, 2  ;;  %v601_v42 = vadd.f32 %v600_v36, %v599_v30  ;;  %v596_v41 = vrot.slane %v595_v8, 1  ;;  %v591_v43 = vadd.f32 %v590_v37, %v589_v6 }
 0x1c7   :  { %v616_v45 = vrot.slane %v2134_v39, 4  ;;  %v611_v47 = vadd.f32 %v2130_v34, %v610_v38  ;;  %1572 = vmatmul.mubr.msk.f32.vlgmr.msra.gmra.mxu0 %vm254_vm2, %v1036_v29 }
 0x1c8   :  { %v2138_v49 = vpop.eup %1710  ;;  %v607_v50 = vadd.f32 %v606_v40, %v605_v35  ;;  %v602_v51 = vrot.slane %v601_v42, 1  ;;  %v597_v52 = vadd.f32 %v596_v41, %v595_v8  ;;  %1714 = vrcp.f32 %v591_v43  ;;  %1122 = vmatprep.mubr.f32.mxu0 %v1806_v3 }
 0x1c9   :  { %v622_v44 = vrot.slane %v2138_v49, 4  ;;  %v617_v55 = vadd.f32 %v2134_v39, %v616_v45  ;;  %v612_v56 = vrot.slane %v611_v47, 2 }
 0x1ca   :  { %v1713_v59 = vpop.eup %1712  ;;  %v608_v60 = vrot.slane %v607_v50, 1  ;;  %v603_v62 = vadd.f32 %v602_v51, %v601_v42  ;;  %1716 = vrcp.f32 %v597_v52 }
 0x1cb   :  { %v628_v63 = vrot.slane %v1713_v59, 4  ;;  %v623_v48 = vadd.f32 %v2138_v49, %v622_v44  ;;  %v618_v0 = vrot.slane %v617_v55, 2  ;;  %v613_v1 = vadd.f32 %v612_v56, %v611_v47 }
 0x1cc   :  { %v609_v4 = vadd.f32 %v608_v60, %v607_v50  ;;  %1718 = vrcp.f32 %v603_v62 }
 0x1cd   :  { %v629_v11 = vadd.f32 %v1713_v59, %v628_v63  ;;  %v624_v13 = vrot.slane %v623_v48, 2  ;;  %v619_v54 = vadd.f32 %v618_v0, %v617_v55  ;;  %v614_v18 = vrot.slane %v613_v1, 1 }
 0x1ce   :  { %1720 = vrcp.f32 %v609_v4 }
 0x1cf   :  { %v630_v25 = vrot.slane %v629_v11, 2  ;;  %v625_v23 = vadd.f32 %v624_v13, %v623_v48  ;;  %v620_v2 = vrot.slane %v619_v54, 1  ;;  %v615_v5 = vadd.f32 %v614_v18, %v613_v1 }
 0x1d0   :  { %1509 = vperm.xlu0 %1696, %v1506_v20  }
 0x1d1   :  { %v631_v30 = vadd.f32 %v630_v25, %v629_v11  ;;  %v626_v33 = vrot.slane %v625_v23, 1  ;;  %v621_v6 = vadd.f32 %v620_v2, %v619_v54  ;;  %1722 = vrcp.f32 %v615_v5 }
 0x1d3   :  { %v632_v35 = vrot.slane %v631_v30, 1  ;;  %v627_v36 = vadd.f32 %v626_v33, %v625_v23  ;;  %1724 = vrcp.f32 %v621_v6 }
 0x1d5   :  { %v1715_v53 = vpop.eup %1714  ;;  %v633_v8 = vadd.f32 %v632_v35, %v631_v30  ;;  %1726 = vrcp.f32 %v627_v36 }
 0x1d6   :  { %v642_v37 = vmul.f32 %v1715_v53, %v2115_v19 }
 0x1d7   :  { %v1717_v38 = vpop.eup %1716  ;;  %1728 = vrcp.f32 %v633_v8 }
 0x1d8   :  { %v643_v40 = vmul.f32 %v1717_v38, %v2118_v24  ;;  %650 = vst [vmem:[#allocation4] sm:$0xff] %v642_v37 }
 0x1d9   :  { %v1719_v42 = vpop.eup %1718 }
 0x1da   :  { %v644_v41 = vmul.f32 %v1719_v42, %v2122_v26  ;;  %651 = vst [vmem:[#allocation4 + $0x8] sm:$0xff] %v643_v40 }
 0x1db   :  { %v1721_v43 = vpop.eup %1720 }
 0x1dc   :  { %v645_v45 = vmul.f32 %v1721_v43, %v2126_v28  ;;  %652 = vst [vmem:[#allocation4 + $0x10] sm:$0xff] %v644_v41 }
 0x1de   :  { %v1723_v47 = vpop.eup %1722  ;;  %653 = vst [vmem:[#allocation4 + $0x18] sm:$0xff] %v645_v45 }
 0x1df   :  { %v646_v50 = vmul.f32 %v1723_v47, %v2130_v34 }
 0x1e0   :  { %v1725_v51 = vpop.eup %1724 }
 0x1e1   :  { %v647_v19 = vmul.f32 %v1725_v51, %v2134_v39  ;;  %654 = vst [vmem:[#allocation4 + $0x20] sm:$0xff] %v646_v50 }
 0x1e2   :  { %v1727_v52 = vpop.eup %1726 }
 0x1e3   :  { %v648_v24 = vmul.f32 %v1727_v52, %v2138_v49  ;;  %655 = vst [vmem:[#allocation4 + $0x28] sm:$0xff] %v647_v19 }
 0x1e4   :  { %v1729_v44 = vpop.eup %1728 }
 0x1e5   :  { %v649_v55 = vmul.f32 %v1729_v44, %v1713_v59  ;;  %656 = vst [vmem:[#allocation4 + $0x30] sm:$0xff] %v648_v24 }
 0x1e7   :  { %657 = vst [vmem:[#allocation4 + $0x38] sm:$0xff] %v649_v55  ;;  %822 = vmatprep.subr.mxu1 %v649_v55 }
 0x1e8   :  { %823 = vmatpush1.msra.mxu1 %v648_v24 }
 0x1e9   :  { %824 = vmatprep.subr.mxu1 %v647_v19 }
 0x1ea   :  { %825 = vmatpush1.msra.mxu1 %v646_v50 }
 0x1eb   :  { %826 = vmatprep.subr.mxu1 %v645_v45 }
 0x1ec   :  { %827 = vmatpush1.msra.mxu1 %v644_v41 }
 0x1ed   :  { %828 = vmatprep.subr.mxu1 %v643_v40 }
 0x1ee   :  { %829 = vmatpush1.msra.mxu1 %v642_v37 }
 0x1ef   :  { %1664 = vmatprep.subr.mxu1 %v1806_v3 }
 0x217   :  { %v779_v26 = vpop.trf.xlu0 }
 0x218   :  { %1566 = vmatmul.mubr.msk.f32.vlgmr.msra.gmra.mxu1 %vm254_vm2, %v779_v26 }
 0x219   :  { %1665 = vmatpush3.msra.mxu1 %v1933_v12  ;;  %1672 = vmatprep.mubr.msk.f32.mxu1 %vm1807_vm1, %v1806_v3  ;;  %v1037_v12 = vmul.f32 %v2147_v61, %v2064_v58 }
 0x21a   :  { %1666 = vmatprep.subr.mxu1 %v1806_v3 }
 0x21b   :  { %1667 = vmatpush3.msra.mxu1 %v1944_v14  ;;  %1573 = vmatmul.mubr.msk.f32.gmra.mxu0 %vm254_vm2, %v1037_v12  ;;  %v1038_v14 = vmul.f32 %v2147_v61, %v2072_v7 }
 0x21c   :  { %1668 = vmatprep.subr.mxu1 %v1806_v3  ;;  %1128 = vmatprep.mubr.f32.mxu0 %v1806_v3 }
 0x21d   :  { %1669 = vmatpush3.msra.mxu1 %v1953_v15  ;;  %v1039_v15 = vmul.f32 %v2147_v61, %v2081_v16 }
 0x21e   :  { %1670 = vmatprep.subr.mxu1 %v1806_v3 }
 0x21f   :  { %1671 = vmatpush3.msra.mxu1 %v1965_v17  ;;  %1574 = vmatmul.mubr.msk.f32.gmra.mxu0 %vm254_vm2, %v1038_v14 }
 0x220   :  { %1673 = vmatmul.mubr.msk.f32.vlgmr.msra.gmra.mxu1 %vm254_vm2, %v2099_v27  ;;  %1675 = vmatprep.subr.mxu1 %v1983_v21 }
 0x221   :  { %1676 = vmatpush3.msra.mxu1 %v1983_v21  ;;  %1134 = vmatprep.mubr.f32.mxu0 %v1806_v3 }
 0x222   :  { %1677 = vmatprep.subr.mxu1 %v1990_v22 }
 0x223   :  { %1678 = vmatpush3.msra.mxu1 %v1990_v22  ;;  %1575 = vmatmul.mubr.msk.f32.gmra.mxu0 %vm254_vm2, %v1039_v15 }
 0x224   :  { %1679 = vmatprep.subr.mxu1 %v2031_v31 }
 0x225   :  { %1680 = vmatpush3.msra.mxu1 %v2031_v31 }
 0x226   :  { %1681 = vmatprep.subr.mxu1 %v2038_v32 }
 0x227   :  { %1682 = vmatpush3.msra.mxu1 %v2038_v32 }
 0x2d8   :  { %v2192_v17 = vpop.f32.mrf.mxu1 }
 0x2da   :  { %v2194_v21 = vpop.f32.mrf.mxu1 }
 0x2e0   :  { %v1032_v22 = vpop.f32.mrf.mxu1 }
 0x2e1   :  { %v1033_v31 = vadd.f32 %v2046_v46, %v1032_v22  ;;  %v1118_v46 = vpop.f32.mrf.mxu0 }
 0x2e2   :  { %v1674_v32 = vpop.f32.mrf.mxu1  ;;  %v1141_v49 = vrot.slane %v1118_v46, 4 }
 0x2e3   :  { %v1287_v27 = vmul.f32 %v1033_v31, %v2064_v58  ;;  %v1286_v28 = vmul.f32 %v1033_v31, %v2059_v57  ;;  %v1288_v34 = vmul.f32 %v1033_v31, %v2072_v7  ;;  %v1289_v39 = vmul.f32 %v1033_v31, %v2081_v16  ;;  %v1120_v56 = vpop.f32.mrf.mxu0 }
 0x2e4   :  { %v1147_v58 = vrot.slane %v1120_v56, 4  ;;  %v1142_v59 = vmax.f32 %v1118_v46, %v1141_v49 }
 0x2e5   :  { %1683 = vmatprep.mubr.msk.f32.mxu1 %vm254_vm2, %v1286_v28  ;;  %v1124_v11 = vpop.f32.mrf.mxu0 }
 0x2e6   :  { %1684 = vmatmul.mubr.msk.f32.vlgmr.msra.gmra.mxu1 %vm254_vm2, %v1287_v27  ;;  %v1148_v57 = vmax.f32 %v1120_v56, %v1147_v58  ;;  %v1143_v60 = vrot.slane %v1142_v59, 2  ;;  %v1153_v13 = vrot.slane %v1124_v11, 4 }
 0x2e7   :  { %1686 = vmatprep.mubr.msk.f32.mxu1 %vm254_vm2, %v1288_v34  ;;  %v1126_v54 = vpop.f32.mrf.mxu0 }
 0x2e8   :  { %v1149_v62 = vrot.slane %v1148_v57, 2  ;;  %v1144_v63 = vmax.f32 %v1142_v59, %v1143_v60  ;;  %v1154_v18 = vmax.f32 %v1124_v11, %v1153_v13  ;;  %v1159_v20 = vrot.slane %v1126_v54, 4 }
 0x2e9   :  { %v1130_v23 = vpop.f32.mrf.mxu0 }
 0x2ea   :  { %1687 = vmatmul.mubr.msk.f32.gmra.mxu1 %vm254_vm2, %v1289_v39  ;;  %v1150_v7 = vmax.f32 %v1148_v57, %v1149_v62  ;;  %v1145_v48 = vrot.slane %v1144_v63, 1  ;;  %v1155_v9 = vrot.slane %v1154_v18, 2  ;;  %v1160_v25 = vmax.f32 %v1126_v54, %v1159_v20 }
 0x2eb   :  { %1490 = vmatprep.mubr.f32.mxu1 %v1806_v3  ;;  %v1165_v29 = vrot.slane %v1130_v23, 4  ;;  %v1132_v30 = vpop.f32.mrf.mxu0 }
 0x2ec   :  { %v1151_v0 = vrot.slane %v1150_v7, 1  ;;  %v1146_v1 = vmax.f32 %v1144_v63, %v1145_v48  ;;  %v1156_v2 = vmax.f32 %v1154_v18, %v1155_v9  ;;  %v1161_v5 = vrot.slane %v1160_v25, 2 }
 0x2ed   :  { %v1166_v35 = vmax.f32 %v1130_v23, %v1165_v29  ;;  %v1171_v36 = vrot.slane %v1132_v30, 4  ;;  %v1136_v53 = vpop.f32.mrf.mxu0 }
 0x2ee   :  { %v1152_v4 = vmax.f32 %v1150_v7, %v1151_v0  ;;  %v1189_v10 = vsub.f32 %v1118_v46, %v1146_v1  ;;  %v1157_v33 = vrot.slane %v1156_v2, 1  ;;  %v1162_v6 = vmax.f32 %v1160_v25, %v1161_v5 }
 0x2ef   :  { %v1167_v38 = vrot.slane %v1166_v35, 2  ;;  %v1172_v40 = vmax.f32 %v1132_v30, %v1171_v36  ;;  %v1177_v42 = vrot.slane %v1136_v53, 4  ;;  %v1138_v41 = vpop.f32.mrf.mxu0 }
 0x2f0   :  { %v1190_v16 = vsub.f32 %v1120_v56, %v1152_v4  ;;  %v1197_v3 = vmul.f32 1.442695, %v1189_v10  ;;  %v1158_v8 = vmax.f32 %v1156_v2, %v1157_v33  ;;  %v1163_v37 = vrot.slane %v1162_v6, 1 }
 0x2f1   :  { %v1168_v47 = vmax.f32 %v1166_v35, %v1167_v38  ;;  %v1173_v50 = vrot.slane %v1172_v40, 2  ;;  %v1178_v51 = vmax.f32 %v1136_v53, %v1177_v42  ;;  %v1183_v19 = vrot.slane %v1138_v41, 4 }
 0x2f2   :  { %v1199_v61 = vmul.f32 1.442695, %v1190_v16  ;;  %1730 = vpow2.f32 %v1197_v3  ;;  %v1191_v43 = vsub.f32 %v1124_v11, %v1158_v8  ;;  %v1164_v45 = vmax.f32 %v1162_v6, %v1163_v37 }
 0x2f3   :  { %v1169_v44 = vrot.slane %v1168_v47, 1  ;;  %v1174_v55 = vmax.f32 %v1172_v40, %v1173_v50  ;;  %v1179_v26 = vrot.slane %v1178_v51, 2  ;;  %v1184_v12 = vmax.f32 %v1138_v41, %v1183_v19 }
 0x2f4   :  { %1732 = vpow2.f32 %v1199_v61  ;;  %v1201_v52 = vmul.f32 1.442695, %v1191_v43  ;;  %v1192_v24 = vsub.f32 %v1126_v54, %v1164_v45 }
 0x2f5   :  { %v1170_v15 = vmax.f32 %v1168_v47, %v1169_v44  ;;  %v1175_v22 = vrot.slane %v1174_v55, 1  ;;  %v1180_v31 = vmax.f32 %v1178_v51, %v1179_v26  ;;  %v1185_v32 = vrot.slane %v1184_v12, 2 }
 0x2f6   :  { %1734 = vpow2.f32 %v1201_v52  ;;  %v1203_v14 = vmul.f32 1.442695, %v1192_v24 }
 0x2f7   :  { %v1193_v27 = vsub.f32 %v1130_v23, %v1170_v15  ;;  %v1176_v28 = vmax.f32 %v1174_v55, %v1175_v22  ;;  %v1181_v39 = vrot.slane %v1180_v31, 1  ;;  %v1186_v46 = vmax.f32 %v1184_v12, %v1185_v32 }
 0x2f8   :  { %1736 = vpow2.f32 %v1203_v14 }
 0x2f9   :  { %v1205_v56 = vmul.f32 1.442695, %v1193_v27  ;;  %v1194_v58 = vsub.f32 %v1132_v30, %v1176_v28  ;;  %v1182_v59 = vmax.f32 %v1180_v31, %v1181_v39  ;;  %v1187_v57 = vrot.slane %v1186_v46, 1 }
 0x2fb   :  { %1738 = vpow2.f32 %v1205_v56  ;;  %v1207_v60 = vmul.f32 1.442695, %v1194_v58  ;;  %v1195_v62 = vsub.f32 %v1136_v53, %v1182_v59  ;;  %v1188_v63 = vmax.f32 %v1186_v46, %v1187_v57 }
 0x2fd   :  { %1740 = vpow2.f32 %v1207_v60  ;;  %v1209_v0 = vmul.f32 1.442695, %v1195_v62  ;;  %v1196_v1 = vsub.f32 %v1138_v41, %v1188_v63 }
 0x2ff   :  { %v2206_v34 = vpop.eup %1730  ;;  %1742 = vpow2.f32 %v1209_v0  ;;  %v1211_v16 = vmul.f32 1.442695, %v1196_v1 }
 0x300   :  { %v1213_v48 = vrot.slane %v2206_v34, 4 }
 0x301   :  { %v2208_v49 = vpop.eup %1732  ;;  %1744 = vpow2.f32 %v1211_v16 }
 0x302   :  { %v1219_v7 = vrot.slane %v2208_v49, 4  ;;  %v1214_v10 = vadd.f32 %v2206_v34, %v1213_v48 }
 0x303   :  { %v2214_v54 = vpop.eup %1734 }
 0x304   :  { %v1220_v4 = vadd.f32 %v2208_v49, %v1219_v7  ;;  %v1215_v13 = vrot.slane %v1214_v10, 2  ;;  %v1225_v3 = vrot.slane %v2214_v54, 4 }
 0x305   :  { %v1737_v61 = vpop.eup %1736 }
 0x306   :  { %v1221_v11 = vrot.slane %v1220_v4, 2  ;;  %v1216_v20 = vadd.f32 %v1215_v13, %v1214_v10  ;;  %v1231_v9 = vrot.slane %v1737_v61, 4  ;;  %v1226_v25 = vadd.f32 %v2214_v54, %v1225_v3 }
 0x308   :  { %v1222_v18 = vadd.f32 %v1221_v11, %v1220_v4  ;;  %v1217_v2 = vrot.slane %v1216_v20, 1  ;;  %v1232_v5 = vadd.f32 %v1737_v61, %v1231_v9  ;;  %v1227_v29 = vrot.slane %v1226_v25, 2  ;;  %v1739_v6 = vpop.eup %1738 }
 0x309   :  { %v1237_v35 = vrot.slane %v1739_v6, 4 }
 0x30a   :  { %v1223_v23 = vrot.slane %v1222_v18, 1  ;;  %v1218_v33 = vadd.f32 %v1217_v2, %v1216_v20  ;;  %v1233_v36 = vrot.slane %v1232_v5, 2  ;;  %v1228_v53 = vadd.f32 %v1227_v29, %v1226_v25  ;;  %v1741_v8 = vpop.eup %1740 }
 0x30b   :  { %v1243_v37 = vrot.slane %v1741_v8, 4  ;;  %v1238_v38 = vadd.f32 %v1739_v6, %v1237_v35 }
 0x30c   :  { %v1224_v30 = vadd.f32 %v1223_v23, %v1222_v18  ;;  %v1234_v40 = vadd.f32 %v1233_v36, %v1232_v5  ;;  %v1229_v42 = vrot.slane %v1228_v53, 1  ;;  %v1743_v41 = vpop.eup %1742 }
 0x30d   :  { %v1244_v43 = vadd.f32 %v1741_v8, %v1243_v37  ;;  %v1239_v45 = vrot.slane %v1238_v38, 2  ;;  %v1249_v51 = vrot.slane %v1743_v41, 4 }
 0x30e   :  { %1746 = vrcp.f32 %v1224_v30  ;;  %v1235_v47 = vrot.slane %v1234_v40, 1  ;;  %v1230_v50 = vadd.f32 %v1229_v42, %v1228_v53  ;;  %v1745_v19 = vpop.eup %1744 }
 0x30f   :  { %1748 = vrcp.f32 %v1218_v33  ;;  %v1245_v52 = vrot.slane %v1244_v43, 2  ;;  %v1240_v24 = vadd.f32 %v1239_v45, %v1238_v38  ;;  %v1255_v55 = vrot.slane %v1745_v19, 4 }
 0x310   :  { %v1236_v44 = vadd.f32 %v1235_v47, %v1234_v40  ;;  %1750 = vrcp.f32 %v1230_v50  ;;  %v1250_v26 = vadd.f32 %v1743_v41, %v1249_v51 }
 0x311   :  { %v1246_v12 = vadd.f32 %v1245_v52, %v1244_v43  ;;  %v1241_v14 = vrot.slane %v1240_v24, 1  ;;  %v1256_v15 = vadd.f32 %v1745_v19, %v1255_v55 }
 0x312   :  { %1752 = vrcp.f32 %v1236_v44  ;;  %v1251_v22 = vrot.slane %v1250_v26, 2 }
 0x313   :  { %v1247_v31 = vrot.slane %v1246_v12, 1  ;;  %v1242_v32 = vadd.f32 %v1241_v14, %v1240_v24  ;;  %v1257_v27 = vrot.slane %v1256_v15, 2 }
 0x314   :  { %v1252_v28 = vadd.f32 %v1251_v22, %v1250_v26 }
 0x315   :  { %v1248_v39 = vadd.f32 %v1247_v31, %v1246_v12  ;;  %1754 = vrcp.f32 %v1242_v32  ;;  %v1258_v56 = vadd.f32 %v1257_v27, %v1256_v15 }
 0x316   :  { %v1253_v58 = vrot.slane %v1252_v28, 1 }
 0x317   :  { %1756 = vrcp.f32 %v1248_v39  ;;  %v1259_v60 = vrot.slane %v1258_v56, 1 }
 0x318   :  { %v1254_v62 = vadd.f32 %v1253_v58, %v1252_v28 }
 0x319   :  { %v1260_v7 = vadd.f32 %v1259_v60, %v1258_v56 }
 0x31a   :  { %1758 = vrcp.f32 %v1254_v62 }
 0x31b   :  { %v1747_v46 = vpop.eup %1746  ;;  %1760 = vrcp.f32 %v1260_v7 }
 0x31c   :  { %v1749_v59 = vpop.eup %1748  ;;  %v1270_v57 = vmul.f32 %v1747_v46, %v2208_v49 }
 0x31d   :  { %v1269_v63 = vmul.f32 %v1749_v59, %v2206_v34  ;;  %v1751_v48 = vpop.eup %1750 }
 0x31e   :  { %1279 = vst [vmem:[#allocation4 + $0x48] sm:$0xff] %v1270_v57  ;;  %v1271_v0 = vmul.f32 %v1751_v48, %v2214_v54 }
 0x31f   :  { %1278 = vst [vmem:[#allocation4 + $0x40] sm:$0xff] %v1269_v63  ;;  %v1753_v1 = vpop.eup %1752 }
 0x320   :  { %v1272_v4 = vmul.f32 %v1753_v1, %v1737_v61  ;;  %1280 = vst [vmem:[#allocation4 + $0x50] sm:$0xff] %v1271_v0 }
 0x322   :  { %1281 = vst [vmem:[#allocation4 + $0x58] sm:$0xff] %v1272_v4  ;;  %v1755_v10 = vpop.eup %1754 }
 0x323   :  { %v1273_v16 = vmul.f32 %v1755_v10, %v1739_v6 }
 0x324   :  { %v1757_v11 = vpop.eup %1756 }
 0x325   :  { %v1274_v49 = vmul.f32 %v1757_v11, %v1741_v8  ;;  %1282 = vst [vmem:[#allocation4 + $0x60] sm:$0xff] %v1273_v16 }
 0x327   :  { %v1759_v13 = vpop.eup %1758  ;;  %1283 = vst [vmem:[#allocation4 + $0x68] sm:$0xff] %v1274_v49 }
 0x328   :  { %v1275_v34 = vmul.f32 %v1759_v13, %v1743_v41  ;;  %v1761_v3 = vpop.eup %1760 }
 0x329   :  { %v1276_v18 = vmul.f32 %v1761_v3, %v1745_v19 }
 0x32a   :  { %1284 = vst [vmem:[#allocation4 + $0x70] sm:$0xff] %v1275_v34 }
 0x32b   :  { %1285 = vst [vmem:[#allocation4 + $0x78] sm:$0xff] %v1276_v18  ;;  %1450 = vmatprep.subr.mxu1 %v1276_v18 }
 0x32c   :  { %1451 = vmatpush1.msra.mxu1 %v1275_v34 }
 0x32d   :  { %1452 = vmatprep.subr.mxu1 %v1274_v49 }
 0x32e   :  { %1453 = vmatpush1.msra.mxu1 %v1273_v16 }
 0x32f   :  { %1454 = vmatprep.subr.mxu1 %v1272_v4 }
 0x330   :  { %1455 = vmatpush1.msra.mxu1 %v1271_v0 }
 0x331   :  { %1456 = vmatprep.subr.mxu1 %v1270_v57 }
 0x332   :  { %1457 = vmatpush1.msra.mxu1 %v1269_v63 }
 0x3a6   :  { %v1685_v54 = vpop.f32.mrf.mxu1 }
 0x3a8   :  { %v1372_v20 = vpop.f32.mrf.mxu1 }
 0x3a9   :  { %1391 = vxpose.xlu1.b32.start [1/4] (short) (narrow) %v1372_v20, 8 }
 0x3aa   :  { %v1688_v61 = vpop.f32.mrf.mxu1 }
 0x3ac   :  { %v1382_v9 = vpop.f32.mrf.mxu1 }
 0x3ad   :  { %1392 = vxpose.xlu1.b32.cont [2/4] (short) (narrow) %v1685_v54, 8 }
 0x3b1   :  { %1393 = vxpose.xlu1.b32.cont [3/4] (short) (narrow) %v1382_v9, 8 }
 0x3b5   :  { %1394 = vxpose.xlu1.b32.end [4/4] (short) (narrow) %v1688_v61, 8 }
 0x425   :  { %v1407_v25 = vpop.trf.xlu1 }
 0x426   :  { %1580 = vmatmul.mubr.msk.f32.vlgmr.msra.gmra.mxu1 %vm254_vm2, %v1407_v25 }
 0x427   :  { %1773 = shalt.err (!%p1770_p4)
}
 0x428   :  { %s1810_s13 = smov 256   ;;  %s1811_s14 = smov 16   ;;  %vm1503_vm3 = vcmask 1043456   ;;  %v1510_v29 = vpop.permute.xlu0 %1509 }
 0x429   :  { %1537 = dma.vmem_to_hbm [thread:$0]  %s1532_s30, 2048, %s2242_s12, [#allocation5], %s1810_s13, %s1810_s13, %s1811_s14  }
 0x42a   :  { %s1812_s17 = smov [#allocation2]  }
 0x42b   :  { %s1522_s18 = sshll.u32 %s1812_s17, 4  ;;  %s1523_s18 = int_to_ptr.vmem [resolvable:$true] %s1522_s18 }
 0x42c   :  { %s1782_s6 = scalar_lea.vmem %s1523_s18, 256  ;;  %p1787_p6 = scmp.lt.s32.totalorder %s1523_s18, %s1523_s18 }
 0x42d   :  { %p1783_p5 = scmp.ne.s32.totalorder %s1523_s18, %s1782_s6  ;;  %p1788_p7 = scmp.lt.s32.totalorder %s1782_s6, %s1782_s6 }
 0x42f   :  { %p1789_p8 = por %p1788_p7, %p1787_p6 }
 0x431   :  { %p1790_p9 = pnand %p1789_p8, %p1783_p5 }
 0x4e6   :  { %v1492_v23 = vpop.f32.mrf.mxu1 }
 0x4e7   :  { %v1499_v2 = vrot.slane %v1492_v23, 4 }
 0x4e8   :  { %v1494_v5 = vpop.f32.mrf.mxu1 }
 0x4e9   :  { %v1500_v30 = vrot.slane %v1494_v5, 4  ;;  %v1504_v33 = vsel %vm1503_vm3, %v2192_v17, %v1499_v2 }
 0x4ea   :  { %v1512_v6 = vadd.f32 %v1510_v29, %v1504_v33 }
 0x4eb   :  { %v1505_v35 = vsel %vm1503_vm3, %v2194_v21, %v1500_v30 }
 0x4ec   :  { %v1513_v36 = vadd.f32 %v1510_v29, %v1505_v35  ;;  %1514 = vst [vmem:[#allocation2] sm:$0xff] %v1512_v6 }
 0x4ee   :  { %1515 = vst [vmem:[#allocation2 + $0x8] sm:$0xff] %v1513_v36 }
 0x4ef   :  { %1793 = shalt.err (!%p1790_p9)
}
 0x4f0   :  { %1525 = dma.vmem_to_hbm [thread:$0]  %s1523_s18, 256, %s2241_s11, [#allocation3]  }
 0x4f1   :  { %1802 = dma.done.wait [#allocation3], 256  }
 0x4f2   :  { %1803 = vsyncadd [#allocation3], 4294967040 }
 0x4f3   :  { %1804 = dma.done.wait [#allocation5], 2048  }
 0x4f4   :  { %1805 = vsyncadd [#allocation5], 4294965248 }
 0x4f5   :  { %1544 = vsyncpa [#allocation3], 1 }
 0x4f6   :  { %1545 = vsyncpa [#allocation5], 1 }

</bundles_post_ra>
